<compile_context>
chip_gen: v6e
topology: v6e:2x2x1
jax: 0.10.0
libtpu: 0.0.40
codegen_flags: <defaults>
</compile_context>

<pallas_src>
import functools

import jax
import jax.numpy as jnp
from jax import lax
from jax.experimental import pallas as pl
from jax.experimental.pallas import tpu as pltpu


_INV_SQRT2 = 0.7071067811865475
_SQRT_2_OVER_PI = 0.7978845608028654


def _gelu_f32(h, approx=False):
    """GELU on an f32 tile. Default exact erf (matches nn.GELU())."""
    if approx:
        # tanh approximation: transcendental goes to the EUP slot.  Does NOT
        # bit-match torch.nn.GELU() default — keep behind a flag.
        return 0.5 * h * (1.0 + jnp.tanh(
            jnp.float32(_SQRT_2_OVER_PI) * (h + 0.044715 * h * h * h)))
    return 0.5 * h * (1.0 + lax.erf(h * jnp.float32(_INV_SQRT2)))


def _round_up(a, b):
    return ((a + b - 1) // b) * b


def _device_kind():
    try:
        return jax.devices()[0].device_kind.lower()
    except Exception:
        return ""


def _vmem_capacity_bytes(kind):
    try:
        info = pltpu.get_tpu_info()
        cap = getattr(info, "vmem_capacity_bytes", None)
        if cap:
            return int(cap)
    except Exception:
        pass
    # Fallback by device-kind string; conservative 64 MiB for unknown / v7x.
    if any(t in kind for t in ("v4", "v5", "v6")):
        return 128 * 1024 * 1024
    return 64 * 1024 * 1024


def _base_row_tile(kind):
    # v5e crossover is ~240 flops/byte -> 256 already saturates the MXU.
    if "v5 lite" in kind or "v5e" in kind or "v5lite" in kind:
        return 256
    # v6e crossover ~650 flops/byte -> need ~768-1024 rows per weight stream.
    if "v6" in kind:
        return 1024
    # v7x: crossover ~311 flops/byte but only 64 MiB VMEM per TC.
    if "7" in kind:
        return 512
    return 512


# ---------------------------------------------------------------------------
# Kernels
# ---------------------------------------------------------------------------

def _mlp_kernel_resident(x_ref, w1_ref, b1_ref, w2_ref, b2_ref, o_ref,
                         *, approx_gelu=False):
    # Weights fully resident in VMEM; single pass, no accumulator.
    h = jnp.dot(x_ref[...], w1_ref[...], preferred_element_type=jnp.float32)
    h = _gelu_f32(h + b1_ref[...].astype(jnp.float32), approx_gelu)
    h = h.astype(w2_ref.dtype)
    y = jnp.dot(h, w2_ref[...], preferred_element_type=jnp.float32)
    o_ref[...] = (y + b2_ref[...].astype(jnp.float32)).astype(o_ref.dtype)


def _mlp_kernel_tiled(x_ref, w1_ref, b1_ref, w2_ref, b2_ref, o_ref, acc_ref,
                      *, approx_gelu=False):
    # Hidden (mlp_dim) axis tiled as grid axis 1; f32 accumulator over it.
    j = pl.program_id(1)

    @pl.when(j == 0)
    def _init():
        acc_ref[...] = jnp.zeros_like(acc_ref)

    h = jnp.dot(x_ref[...], w1_ref[...], preferred_element_type=jnp.float32)
    h = _gelu_f32(h + b1_ref[...].astype(jnp.float32), approx_gelu)
    h = h.astype(w2_ref.dtype)
    acc_ref[...] += jnp.dot(h, w2_ref[...], preferred_element_type=jnp.float32)

    @pl.when(j == pl.num_programs(1) - 1)
    def _finalize():
        y = acc_ref[...] + b2_ref[...].astype(jnp.float32)
        o_ref[...] = y.astype(o_ref.dtype)


# ---------------------------------------------------------------------------
# Wrapper
# ---------------------------------------------------------------------------

def mlp_block(x, w1, b1, w2, b2, *, tm=None, tn=None, approx_gelu=False):
    """Apply MlpBlock to x of shape (..., dim).

    w1: (mlp_dim, dim), b1: (mlp_dim,)   -- PyTorch nn.Linear(dim, mlp_dim)
    w2: (dim, mlp_dim), b2: (dim,)       -- PyTorch nn.Linear(mlp_dim, dim)
    """
    orig_shape = x.shape
    dim = orig_shape[-1]
    mlp_dim = w1.shape[0]
    assert w1.shape == (mlp_dim, dim)
    assert b1.shape == (mlp_dim,)
    assert w2.shape == (dim, mlp_dim)
    assert b2.shape == (dim,)

    rows = 1
    for s in orig_shape[:-1]:
        rows *= s
    x2 = x.reshape(rows, dim)

    x_it = jnp.dtype(x.dtype).itemsize
    w_it = jnp.dtype(w1.dtype).itemsize

    # Lane-dense feature dims: pad to multiples of 128 (zero padding is exact).
    dim_p = _round_up(dim, 128)
    mlp_dim_p = _round_up(mlp_dim, 128)

    kind = _device_kind()
    vmem_cap = _vmem_capacity_bytes(kind)
    vmem_limit = int(vmem_cap * 3 // 4)          # explicit scoped-VMEM limit
    budget = int(vmem_limit * 0.85)              # working-set target

    # ---- row tile ---------------------------------------------------------
    base_tm = _base_row_tile(kind) if tm is None else tm
    tm_eff = min(base_tm, _round_up(rows, 8))
    tm_eff = max(8, _round_up(tm_eff, 8))
    # Keep >= 2 row tiles when there's enough work so the "parallel" row axis
    # shards across both v7x TensorCores.
    if tm is None and rows > 256 and tm_eff >= rows:
        tm_eff = max(8, _round_up((rows + 1) // 2, 8))

    # ---- working-set estimators (2x = conservative double-buffer factor) ---
    def _resident_est(tm_):
        weights = 2 * 2 * dim_p * mlp_dim_p * w_it
        io = 2 * 2 * tm_ * dim_p * x_it
        h = tm_ * mlp_dim_p * (4 + w_it)         # f32 hidden + cast copy
        bias = 2 * (mlp_dim_p + dim_p) * w_it
        return weights + io + h + bias

    def _tiled_est(tm_, tn_):
        weights = 2 * 2 * dim_p * tn_ * w_it
        io = 2 * 2 * tm_ * dim_p * x_it
        h = tm_ * tn_ * (4 + w_it)
        acc = tm_ * dim_p * 4
        bias = 2 * (tn_ + dim_p) * w_it
        return weights + io + h + acc + bias

    use_resident = (tn is None or tn == mlp_dim_p) \
        and _resident_est(tm_eff) <= budget

    if use_resident:
        tn_eff = mlp_dim_p
    else:
        if tn is not None:
            tn_eff = tn
        else:
            cands = [c for c in (512, 256, 128) if mlp_dim_p % c == 0] or [128]
            tn_eff = cands[0]
            while _tiled_est(tm_eff, tn_eff) > budget and tm_eff > 64:
                tm_eff = max(64, _round_up(tm_eff // 2, 8))
            while _tiled_est(tm_eff, tn_eff) > budget and len(cands) > 1:
                cands = cands[1:]
                tn_eff = cands[0]
        assert mlp_dim_p % tn_eff == 0, "tn must divide padded mlp_dim"

    padded_rows = _round_up(rows, tm_eff)
    n_row_tiles = padded_rows // tm_eff

    # ---- pad / transpose operands (exact: zero padding) --------------------
    if padded_rows != rows or dim_p != dim:
        x2 = jnp.pad(x2, ((0, padded_rows - rows), (0, dim_p - dim)))

    w1_t = jnp.transpose(w1)                     # (dim, mlp_dim)
    w2_t = jnp.transpose(w2)                     # (mlp_dim, dim)
    if dim_p != dim or mlp_dim_p != mlp_dim:
        w1_t = jnp.pad(w1_t, ((0, dim_p - dim), (0, mlp_dim_p - mlp_dim)))
        w2_t = jnp.pad(w2_t, ((0, mlp_dim_p - mlp_dim), (0, dim_p - dim)))
        b1_p = jnp.pad(b1, (0, mlp_dim_p - mlp_dim))
        b2_p = jnp.pad(b2, (0, dim_p - dim))
    else:
        b1_p, b2_p = b1, b2
    b1_2d = b1_p.reshape(1, mlp_dim_p)
    b2_2d = b2_p.reshape(1, dim_p)

    # ---- cost estimate (weights re-streamed per row tile on tiled path) ----
    weight_passes = 1 if use_resident else n_row_tiles
    cost = pl.CostEstimate(
        flops=int(4 * padded_rows * dim_p * mlp_dim_p),
        transcendentals=int(padded_rows * mlp_dim_p),
        bytes_accessed=int(
            2 * padded_rows * dim_p * x_it
            + weight_passes * 2 * dim_p * mlp_dim_p * w_it
            + (mlp_dim_p + dim_p) * w_it))

    if use_resident:
        compiler_params = pltpu.CompilerParams(
            dimension_semantics=("parallel",),
            vmem_limit_bytes=vmem_limit)
        out = pl.pallas_call(
            functools.partial(_mlp_kernel_resident, approx_gelu=approx_gelu),
            out_shape=jax.ShapeDtypeStruct((padded_rows, dim_p), x.dtype),
            grid_spec=pltpu.PrefetchScalarGridSpec(
                num_scalar_prefetch=0,
                grid=(n_row_tiles,),
                in_specs=[
                    pl.BlockSpec((tm_eff, dim_p), lambda i: (i, 0)),
                    pl.BlockSpec((dim_p, mlp_dim_p), lambda i: (0, 0)),
                    pl.BlockSpec((1, mlp_dim_p), lambda i: (0, 0)),
                    pl.BlockSpec((mlp_dim_p, dim_p), lambda i: (0, 0)),
                    pl.BlockSpec((1, dim_p), lambda i: (0, 0)),
                ],
                out_specs=pl.BlockSpec((tm_eff, dim_p), lambda i: (i, 0)),
            ),
            compiler_params=compiler_params,
            cost_estimate=cost,
        )(x2, w1_t, b1_2d, w2_t, b2_2d)
    else:
        # Hidden-axis-tiled fallback for weights that do not fit VMEM.
        # (A pipeline_mode=pl.Buffered(3) on the weight specs could further
        #  hide the per-step weight DMA; omitted to keep lowering simple.)
        compiler_params = pltpu.CompilerParams(
            dimension_semantics=("parallel", "arbitrary"),
            vmem_limit_bytes=vmem_limit)
        out = pl.pallas_call(
            functools.partial(_mlp_kernel_tiled, approx_gelu=approx_gelu),
            out_shape=jax.ShapeDtypeStruct((padded_rows, dim_p), x.dtype),
            grid_spec=pltpu.PrefetchScalarGridSpec(
                num_scalar_prefetch=0,
                grid=(n_row_tiles, mlp_dim_p // tn_eff),
                in_specs=[
                    pl.BlockSpec((tm_eff, dim_p), lambda i, j: (i, 0)),
                    pl.BlockSpec((dim_p, tn_eff), lambda i, j: (0, j)),
                    pl.BlockSpec((1, tn_eff), lambda i, j: (0, j)),
                    pl.BlockSpec((tn_eff, dim_p), lambda i, j: (j, 0)),
                    pl.BlockSpec((1, dim_p), lambda i, j: (0, 0)),
                ],
                out_specs=pl.BlockSpec((tm_eff, dim_p), lambda i, j: (i, 0)),
                scratch_shapes=[pltpu.VMEM((tm_eff, dim_p), jnp.float32)],
            ),
            compiler_params=compiler_params,
            cost_estimate=cost,
        )(x2, w1_t, b1_2d, w2_t, b2_2d)

    out = out[:rows, :dim]
    return out.reshape(orig_shape)


# ---------------------------------------------------------------------------
# Reference + init
# ---------------------------------------------------------------------------

def init_mlp_block_params(key, dim, mlp_dim, dtype=jnp.float32):
    """Deterministic init mimicking nn.Linear default (uniform +-1/sqrt(fan_in))."""
    k1, k2, k3, k4 = jax.random.split(key, 4)
    bound1 = 1.0 / float(dim) ** 0.5
    bound2 = 1.0 / float(mlp_dim) ** 0.5
    w1 = jax.random.uniform(k1, (mlp_dim, dim), dtype, -bound1, bound1)
    b1 = jax.random.uniform(k2, (mlp_dim,), dtype, -bound1, bound1)
    w2 = jax.random.uniform(k3, (dim, mlp_dim), dtype, -bound2, bound2)
    b2 = jax.random.uniform(k4, (dim,), dtype, -bound2, bound2)
    return w1, b1, w2, b2


def mlp_block_ref(x, w1, b1, w2, b2):
    """Pure-JAX reference matching the PyTorch forward (exact GELU)."""
    h = jnp.einsum("...d,md->...m", x, w1) + b1
    h = 0.5 * h * (1.0 + lax.erf(h / jnp.sqrt(2.0)))
    y = jnp.einsum("...m,dm->...d", h, w2) + b2
    return y


if __name__ == "__main__":
    mlp_jit = jax.jit(mlp_block, static_argnames=("tm", "tn", "approx_gelu"))

    key = jax.random.PRNGKey(0)

    # Test 1: small MLP-Mixer-like shapes -> weights-resident fast path.
    batch, n_patches, dim, mlp_dim = 2, 8, 32, 64
    kx, kp, key = jax.random.split(key, 3)
    x = jax.random.normal(kx, (batch, n_patches, dim), dtype=jnp.float32)
    w1, b1, w2, b2 = init_mlp_block_params(kp, dim, mlp_dim)
    out = jax.block_until_ready(mlp_jit(x, w1, b1, w2, b2))
    ref = mlp_block_ref(x, w1, b1, w2, b2)
    assert out.shape == x.shape
    assert jnp.allclose(out, ref, atol=2e-5, rtol=2e-5), "resident path mismatch"

    # Test 2: force the hidden-axis-tiled accumulator path (tn < mlp_dim).
    dim2, mlp_dim2 = 128, 256
    kx2, kp2 = jax.random.split(key)
    x2 = jax.random.normal(kx2, (batch, n_patches, dim2), dtype=jnp.float32)
    w1b, b1b, w2b, b2b = init_mlp_block_params(kp2, dim2, mlp_dim2)
    out2 = jax.block_until_ready(mlp_jit(x2, w1b, b1b, w2b, b2b, tn=128))
    ref2 = mlp_block_ref(x2, w1b, b1b, w2b, b2b)
    assert out2.shape == x2.shape
    assert jnp.allclose(out2, ref2, atol=2e-5, rtol=2e-5), "tiled path mismatch"

    print("KERNEL_OK")
</pallas_src>

<mosaic_0001>
module attributes {stable_mosaic.version = 11 : i64} {
  func.func @_mlp_kernel_resident(%arg0: i32, %arg1: memref<16x128xf32, #tpu.memory_space<vmem>>, %arg2: memref<128x128xf32, #tpu.memory_space<vmem>>, %arg3: memref<1x128xf32, #tpu.memory_space<vmem>>, %arg4: memref<128x128xf32, #tpu.memory_space<vmem>>, %arg5: memref<1x128xf32, #tpu.memory_space<vmem>>, %arg6: memref<16x128xf32, #tpu.memory_space<vmem>>) attributes {dimension_semantics = [#tpu.dimension_semantics<parallel>], iteration_bounds = array<i64: 1>, scalar_prefetch = 0 : i64, scratch_operands = 0 : i64, tpu.core_type = #tpu.core_type<tc>, window_params = [{transform_indices = @transform_0, window_bounds = array<i64: 16, 128>}, {pipeline_mode = #tpu.pipeline_mode<synchronous>, transform_indices = @transform_1, window_bounds = array<i64: 128, 128>}, {pipeline_mode = #tpu.pipeline_mode<synchronous>, transform_indices = @transform_2, window_bounds = array<i64: 1, 128>}, {pipeline_mode = #tpu.pipeline_mode<synchronous>, transform_indices = @transform_3, window_bounds = array<i64: 128, 128>}, {pipeline_mode = #tpu.pipeline_mode<synchronous>, transform_indices = @transform_4, window_bounds = array<i64: 1, 128>}, {transform_indices = @transform_5, window_bounds = array<i64: 16, 128>}]} {
    %c0 = arith.constant 0 : index
    %c0_0 = arith.constant 0 : index
    %0 = vector.load %arg1[%c0, %c0_0] : memref<16x128xf32, #tpu.memory_space<vmem>>, vector<16x128xf32>
    %c0_1 = arith.constant 0 : index
    %c0_2 = arith.constant 0 : index
    %1 = vector.load %arg2[%c0_1, %c0_2] : memref<128x128xf32, #tpu.memory_space<vmem>>, vector<128x128xf32>
    %cst = arith.constant dense<0.000000e+00> : vector<16x128xf32>
    %2 = tpu.matmul %0, %1, %cst {dimension_numbers = #tpu.dot_dimension_numbers<[1], [0], [0], [1], [0, 0, 1, 1], [], []>} : vector<16x128xf32>, vector<128x128xf32>, vector<16x128xf32> -> vector<16x128xf32>
    %c0_3 = arith.constant 0 : index
    %c0_4 = arith.constant 0 : index
    %3 = vector.load %arg3[%c0_3, %c0_4] : memref<1x128xf32, #tpu.memory_space<vmem>>, vector<1x128xf32>
    %4 = vector.broadcast %3 : vector<1x128xf32> to vector<16x128xf32>
    %5 = arith.addf %2, %4 : vector<16x128xf32>
    %cst_5 = arith.constant 5.000000e-01 : f32
    %6 = vector.broadcast %cst_5 : f32 to vector<16x128xf32>
    %7 = arith.mulf %6, %5 : vector<16x128xf32>
    %cst_6 = arith.constant 0.707106769 : f32
    %8 = vector.broadcast %cst_6 : f32 to vector<16x128xf32>
    %9 = arith.mulf %5, %8 : vector<16x128xf32>
    %10 = math.erf %9 : vector<16x128xf32>
    %cst_7 = arith.constant 1.000000e+00 : f32
    %11 = vector.broadcast %cst_7 : f32 to vector<16x128xf32>
    %12 = arith.addf %11, %10 : vector<16x128xf32>
    %13 = arith.mulf %7, %12 : vector<16x128xf32>
    %c0_8 = arith.constant 0 : index
    %c0_9 = arith.constant 0 : index
    %14 = vector.load %arg4[%c0_8, %c0_9] : memref<128x128xf32, #tpu.memory_space<vmem>>, vector<128x128xf32>
    %cst_10 = arith.constant dense<0.000000e+00> : vector<16x128xf32>
    %15 = tpu.matmul %13, %14, %cst_10 {dimension_numbers = #tpu.dot_dimension_numbers<[1], [0], [0], [1], [0, 0, 1, 1], [], []>} : vector<16x128xf32>, vector<128x128xf32>, vector<16x128xf32> -> vector<16x128xf32>
    %c0_11 = arith.constant 0 : index
    %c0_12 = arith.constant 0 : index
    %16 = vector.load %arg5[%c0_11, %c0_12] : memref<1x128xf32, #tpu.memory_space<vmem>>, vector<1x128xf32>
    %17 = vector.broadcast %16 : vector<1x128xf32> to vector<16x128xf32>
    %18 = arith.addf %15, %17 : vector<16x128xf32>
    %c0_13 = arith.constant 0 : index
    %c0_14 = arith.constant 0 : index
    %19 = vector.load %arg6[%c0_13, %c0_14] : memref<16x128xf32, #tpu.memory_space<vmem>>, vector<16x128xf32>
    tpu.vector_store %arg6[%c0_13, %c0_14], %18 {strides = array<i32>} : memref<16x128xf32, #tpu.memory_space<vmem>>, vector<16x128xf32>,
    return
  }
  func.func @transform_0(%arg0: i32) -> (i32, i32) {
    %c0_i32 = arith.constant 0 : i32
    %c0_i32_0 = arith.constant 0 : i32
    return %arg0, %c0_i32 : i32, i32
  }
  func.func @transform_1(%arg0: i32) -> (i32, i32) {
    %c0_i32 = arith.constant 0 : i32
    %c0_i32_0 = arith.constant 0 : i32
    %c0_i32_1 = arith.constant 0 : i32
    return %c0_i32, %c0_i32_0 : i32, i32
  }
  func.func @transform_2(%arg0: i32) -> (i32, i32) {
    %c0_i32 = arith.constant 0 : i32
    %c0_i32_0 = arith.constant 0 : i32
    %c0_i32_1 = arith.constant 0 : i32
    return %c0_i32, %c0_i32_0 : i32, i32
  }
  func.func @transform_3(%arg0: i32) -> (i32, i32) {
    %c0_i32 = arith.constant 0 : i32
    %c0_i32_0 = arith.constant 0 : i32
    %c0_i32_1 = arith.constant 0 : i32
    return %c0_i32, %c0_i32_0 : i32, i32
  }
  func.func @transform_4(%arg0: i32) -> (i32, i32) {
    %c0_i32 = arith.constant 0 : i32
    %c0_i32_0 = arith.constant 0 : i32
    %c0_i32_1 = arith.constant 0 : i32
    return %c0_i32, %c0_i32_0 : i32, i32
  }
  func.func @transform_5(%arg0: i32) -> (i32, i32) {
    %c0_i32 = arith.constant 0 : i32
    %c0_i32_0 = arith.constant 0 : i32
    return %arg0, %c0_i32 : i32, i32
  }
}

</mosaic_0001>

<bundles_post_ra>
// kernel: mlp_block.1
= control target key start
LH: loop header
LB: loop body
LE: loop exit
PB: predicated region body
PF: predicated region fallthrough
CT: control target
= control target key end

     0   :  { %s490_s1 = inlined_call_operand.vmem [shape: f32[128,128], index: 1, kind: input, shape index: {}]   ;;  %s491_s0 = inlined_call_operand.vmem [shape: f32[16,128], index: 0, kind: input, shape index: {}]   ;;  %s492_s3 = inlined_call_operand.vmem [shape: f32[128,128], index: 3, kind: input, shape index: {}]   ;;  %s493_s2 = inlined_call_operand.vmem [shape: f32[1,128], index: 2, kind: input, shape index: {}]   ;;  %s494_s4 = inlined_call_operand.vmem [shape: f32[1,128], index: 4, kind: input, shape index: {}]   ;;  %s495_s5 = inlined_call_operand.vmem [shape: f32[16,128], index: 5, kind: output, shape index: {}]  }
   0x1   :  { %v37_v0 = vld [vmem:[%s490_s1 + $0x78] sm:$0xff]  ;;  %v36_v1 = vld [vmem:[%s490_s1 + $0x70] sm:$0xff]  ;;  %v35_v2 = vld [vmem:[%s490_s1 + $0x68] sm:$0xff] }
   0x2   :  { %272 = vmatprep.subr.mxu0 %v37_v0  ;;  %v34_v3 = vld [vmem:[%s490_s1 + $0x60] sm:$0xff]  ;;  %v33_v5 = vld [vmem:[%s490_s1 + $0x58] sm:$0xff]  ;;  %v144_v7 = vld [vmem:[%s492_s3 + $0x70] sm:$0xff] }
   0x3   :  { %273 = vmatpush3.msra.mxu0 %v37_v0  ;;  %v20_v4 = vld [vmem:[%s491_s0] sm:$0xff]  ;;  %v145_v6 = vld [vmem:[%s492_s3 + $0x78] sm:$0xff]  ;;  %v32_v8 = vld [vmem:[%s490_s1 + $0x50] sm:$0xff] }
   0x4   :  { %274 = vmatprep.subr.mxu0 %v36_v1  ;;  %304 = vmatprep.mubr.f32.mxu0 %v20_v4  ;;  %v143_v9 = vld [vmem:[%s492_s3 + $0x68] sm:$0xff]  ;;  %v30_v11 = vld [vmem:[%s490_s1 + $0x40] sm:$0xff]  ;;  %v29_v12 = vld [vmem:[%s490_s1 + $0x38] sm:$0xff] }
   0x5   :  { %275 = vmatpush3.msra.mxu0 %v36_v1  ;;  %307 = vmatprep.subr.mxu1 %v145_v6  ;;  %v31_v10 = vld [vmem:[%s490_s1 + $0x48] sm:$0xff]  ;;  %v28_v13 = vld [vmem:[%s490_s1 + $0x30] sm:$0xff]  ;;  %v26_v15 = vld [vmem:[%s490_s1 + $0x20] sm:$0xff] }
   0x6   :  { %276 = vmatprep.subr.mxu0 %v35_v2  ;;  %308 = vmatpush3.msra.mxu1 %v145_v6  ;;  %v27_v14 = vld [vmem:[%s490_s1 + $0x28] sm:$0xff]  ;;  %v25_v16 = vld [vmem:[%s490_s1 + $0x18] sm:$0xff]  ;;  %v24_v17 = vld [vmem:[%s490_s1 + $0x10] sm:$0xff] }
   0x7   :  { %277 = vmatpush3.msra.mxu0 %v35_v2  ;;  %309 = vmatprep.subr.mxu1 %v144_v7  ;;  %v23_v18 = vld [vmem:[%s490_s1 + $0x8] sm:$0xff]  ;;  %v22_v19 = vld [vmem:[%s490_s1] sm:$0xff]  ;;  %v141_v22 = vld [vmem:[%s492_s3 + $0x58] sm:$0xff] }
   0x8   :  { %278 = vmatprep.subr.mxu0 %v34_v3  ;;  %310 = vmatpush3.msra.mxu1 %v144_v7  ;;  %v21_v20 = vld [vmem:[%s491_s0 + $0x8] sm:$0xff]  ;;  %v142_v21 = vld [vmem:[%s492_s3 + $0x60] sm:$0xff]  ;;  %v140_v23 = vld [vmem:[%s492_s3 + $0x50] sm:$0xff] }
   0x9   :  { %279 = vmatpush3.msra.mxu0 %v34_v3  ;;  %311 = vmatprep.subr.mxu1 %v143_v9  ;;  %v139_v24 = vld [vmem:[%s492_s3 + $0x48] sm:$0xff]  ;;  %v138_v25 = vld [vmem:[%s492_s3 + $0x40] sm:$0xff]  ;;  %v137_v26 = vld [vmem:[%s492_s3 + $0x38] sm:$0xff] }
   0xa   :  { %280 = vmatprep.subr.mxu0 %v33_v5  ;;  %312 = vmatpush3.msra.mxu1 %v143_v9  ;;  %v136_v27 = vld [vmem:[%s492_s3 + $0x30] sm:$0xff]  ;;  %v135_v28 = vld [vmem:[%s492_s3 + $0x28] sm:$0xff]  ;;  %v134_v29 = vld [vmem:[%s492_s3 + $0x20] sm:$0xff] }
   0xb   :  { %281 = vmatpush3.msra.mxu0 %v33_v5  ;;  %313 = vmatprep.subr.mxu1 %v142_v21  ;;  %v133_v30 = vld [vmem:[%s492_s3 + $0x18] sm:$0xff]  ;;  %v132_v31 = vld [vmem:[%s492_s3 + $0x10] sm:$0xff]  ;;  %v131_v32 = vld [vmem:[%s492_s3 + $0x8] sm:$0xff] }
   0xc   :  { %282 = vmatprep.subr.mxu0 %v32_v8  ;;  %314 = vmatpush3.msra.mxu1 %v142_v21  ;;  %v130_v33 = vld [vmem:[%s492_s3] sm:$0xff] }
   0xd   :  { %283 = vmatpush3.msra.mxu0 %v32_v8  ;;  %315 = vmatprep.subr.mxu1 %v141_v22  ;;  %v234_v34 = vld [vmem:[%s493_s2] ss:$0 sm:$0xff] }
   0xe   :  { %284 = vmatprep.subr.mxu0 %v31_v10  ;;  %316 = vmatpush3.msra.mxu1 %v141_v22  ;;  %v235_v49 = vld [vmem:[%s494_s4] ss:$0 sm:$0xff] }
   0xf   :  { %285 = vmatpush3.msra.mxu0 %v31_v10  ;;  %317 = vmatprep.subr.mxu1 %v140_v23 }
  0x10   :  { %286 = vmatprep.subr.mxu0 %v30_v11  ;;  %318 = vmatpush3.msra.mxu1 %v140_v23 }
  0x11   :  { %287 = vmatpush3.msra.mxu0 %v30_v11  ;;  %319 = vmatprep.subr.mxu1 %v139_v24 }
  0x12   :  { %288 = vmatprep.subr.mxu0 %v29_v12  ;;  %320 = vmatpush3.msra.mxu1 %v139_v24 }
  0x13   :  { %289 = vmatpush3.msra.mxu0 %v29_v12  ;;  %321 = vmatprep.subr.mxu1 %v138_v25 }
  0x14   :  { %290 = vmatprep.subr.mxu0 %v28_v13  ;;  %322 = vmatpush3.msra.mxu1 %v138_v25 }
  0x15   :  { %291 = vmatpush3.msra.mxu0 %v28_v13  ;;  %323 = vmatprep.subr.mxu1 %v137_v26 }
  0x16   :  { %292 = vmatprep.subr.mxu0 %v27_v14  ;;  %324 = vmatpush3.msra.mxu1 %v137_v26 }
  0x17   :  { %293 = vmatpush3.msra.mxu0 %v27_v14  ;;  %325 = vmatprep.subr.mxu1 %v136_v27 }
  0x18   :  { %294 = vmatprep.subr.mxu0 %v26_v15  ;;  %326 = vmatpush3.msra.mxu1 %v136_v27 }
  0x19   :  { %295 = vmatpush3.msra.mxu0 %v26_v15  ;;  %327 = vmatprep.subr.mxu1 %v135_v28 }
  0x1a   :  { %296 = vmatprep.subr.mxu0 %v25_v16  ;;  %328 = vmatpush3.msra.mxu1 %v135_v28 }
  0x1b   :  { %297 = vmatpush3.msra.mxu0 %v25_v16  ;;  %329 = vmatprep.subr.mxu1 %v134_v29 }
  0x1c   :  { %298 = vmatprep.subr.mxu0 %v24_v17  ;;  %330 = vmatpush3.msra.mxu1 %v134_v29 }
  0x1d   :  { %299 = vmatpush3.msra.mxu0 %v24_v17  ;;  %331 = vmatprep.subr.mxu1 %v133_v30 }
  0x1e   :  { %300 = vmatprep.subr.mxu0 %v23_v18  ;;  %332 = vmatpush3.msra.mxu1 %v133_v30 }
  0x1f   :  { %301 = vmatpush3.msra.mxu0 %v23_v18  ;;  %333 = vmatprep.subr.mxu1 %v132_v31 }
  0x20   :  { %302 = vmatprep.subr.mxu0 %v22_v19  ;;  %334 = vmatpush3.msra.mxu1 %v132_v31 }
  0x21   :  { %303 = vmatpush3.msra.mxu0 %v22_v19  ;;  %335 = vmatprep.subr.mxu1 %v131_v32 }
  0x22   :  { %305 = vmatmul.mubr.f32.vlgmr.msra.gmra.mxu0 %v21_v20  ;;  %336 = vmatpush3.msra.mxu1 %v131_v32 }
  0x23   :  { %337 = vmatprep.subr.mxu1 %v130_v33 }
  0x24   :  { %338 = vmatpush3.msra.mxu1 %v130_v33 }
  0xe2   :  { %v306_v35 = vpop.f32.mrf.mxu0 }
  0xe3   :  { %v117_v36 = vadd.f32 %v306_v35, %v234_v34 }
  0xe4   :  { %v111_v37 = vpop.f32.mrf.mxu0 }
  0xe5   :  { %v123_v38 = vmul.f32 0.70710677, %v117_v36  ;;  %v112_v39 = vadd.f32 %v234_v34, %v111_v37  ;;  %v121_v46 = vmul.f32 0.5, %v117_v36 }
  0xe7   :  { %342 = verf.f32 %v123_v38  ;;  %v122_v40 = vmul.f32 0.70710677, %v112_v39  ;;  %v120_v44 = vmul.f32 0.5, %v112_v39 }
  0xe9   :  { %344 = verf.f32 %v122_v40 }
  0xf4   :  { %v343_v41 = vpop.eup %342 }
  0xf5   :  { %v127_v43 = vadd.f32 1.0, %v343_v41 }
  0xf6   :  { %v345_v42 = vpop.eup %344 }
  0xf7   :  { %v126_v45 = vadd.f32 1.0, %v345_v42  ;;  %v129_v48 = vmul.f32 %v127_v43, %v121_v46 }
  0xf9   :  { %v128_v47 = vmul.f32 %v126_v45, %v120_v44 }
  0xfb   :  { %339 = vmatprep.mubr.f32.mxu1 %v128_v47 }
  0xfc   :  { %340 = vmatmul.mubr.f32.vlgmr.msra.gmra.mxu1 %v129_v48 }
 0x1bc   :  { %v341_v50 = vpop.f32.mrf.mxu1 }
 0x1bd   :  { %v225_v51 = vadd.f32 %v341_v50, %v235_v49 }
 0x1be   :  { %v219_v52 = vpop.f32.mrf.mxu1 }
 0x1bf   :  { %229 = vst [vmem:[%s495_s5 + $0x8] sm:$0xff] %v225_v51  ;;  %v220_v53 = vadd.f32 %v235_v49, %v219_v52 }
 0x1c1   :  { %228 = vst [vmem:[%s495_s5] sm:$0xff] %v220_v53 }

</bundles_post_ra>
